<compile_context>
chip_gen: v6e
topology: v6e:2x2x1
jax: 0.10.0
libtpu: 0.0.40
codegen_flags: <defaults>
</compile_context>

<pallas_src>
import jax
import jax.numpy as jnp
from jax.experimental import pallas as pl
from jax.experimental.pallas import tpu as pltpu

LANE = 128     # TPU vreg lane width
SUBLANE = 8    # TPU vreg sublane width


def policy_kernel(xt_ref, w1_ref, b1_ref, w2_ref, b2_ref, mu_ref):
    # xt: (S, TB)  w1: (H, S)  b1: (H, 1)  w2: (A_pad8, H)  b2: (A_pad8, 1)
    # fc1 + ReLU (MXU matmul, f32 accumulate).
    h = jnp.dot(w1_ref[...], xt_ref[...], preferred_element_type=jnp.float32)
    h = jnp.maximum(h + b1_ref[...], 0.0)
    # fc2_mean: action dim padded to 8 sublanes; lane dim (batch tile) is a
    # multiple of 128 in the grid path -> full-lane unmasked stores.
    mu = jnp.dot(w2_ref[...], h, preferred_element_type=jnp.float32)
    mu = mu + b2_ref[...]
    mu_ref[...] = mu.astype(mu_ref.dtype)


def init_policy_params(key, state_space, action_space, hidden=64):
    """Matches Policy.init_weights(): normal_(weight), zeros_(bias), sigma=10.
    Weights kept in torch layout: W [out, in], b [out]."""
    k1, k2 = jax.random.split(key)
    w1 = jax.random.normal(k1, (hidden, state_space), dtype=jnp.float32)
    b1 = jnp.zeros((hidden,), dtype=jnp.float32)
    w2 = jax.random.normal(k2, (action_space, hidden), dtype=jnp.float32)
    b2 = jnp.zeros((action_space,), dtype=jnp.float32)
    sigma = jnp.array([10.0], dtype=jnp.float32)
    return w1, b1, w2, b2, sigma


def prepare_policy_params(w1, b1, w2, b2, sigma):
    """One-time prep: pad the action (output) dim to 8 *sublanes* and reshape
    biases to column vectors so the kernel broadcasts them over the lane
    (batch) axis."""
    H, S = w1.shape
    A = w2.shape[0]
    a_pad = ((A + SUBLANE - 1) // SUBLANE) * SUBLANE
    w1p = w1.astype(jnp.float32)                                  # (H, S)
    b1p = b1.reshape(H, 1).astype(jnp.float32)                    # (H, 1)
    w2p = jnp.zeros((a_pad, H), jnp.float32).at[:A, :].set(w2.astype(jnp.float32))
    b2p = jnp.zeros((a_pad, 1), jnp.float32).at[:A, :].set(
        b2.reshape(A, 1).astype(jnp.float32))
    return dict(w1=w1p, b1=b1p, w2p=w2p, b2p=b2p,
                sigma=jnp.reshape(sigma, ()).astype(jnp.float32),
                S=S, H=H, A=A, A_pad=a_pad)


def _choose_batch_tile(B, max_tile=2048):
    """Largest multiple of 128 <= max_tile that still leaves >= 2 grid steps,
    so both v7x TensorCores get work (no-op on single-TC v5e/v6e)."""
    return min(max_tile, max(LANE, (B // 2 // LANE) * LANE))


def policy_forward(x, params, *, max_batch_tile=2048, out_dtype=jnp.float32):
    """Fused fc1 -> relu -> fc2_mean in one Pallas kernel.

    Returns (mu [B, A], sigma scalar) — the parameters of Normal(mu, sigma).
    """
    B, S = x.shape
    w1, b1, w2p, b2p = params["w1"], params["b1"], params["w2p"], params["b2p"]
    H, A, A_pad = params["H"], params["A"], params["A_pad"]

    # Batch on lanes: x^T is (S, B), S sits on sublanes.
    x_t = x.astype(jnp.float32).T

    if B >= 2 * LANE:
        # Large-batch (rollout / training) path: stream the batch axis, keep
        # weights resident (constant index_map -> no re-DMA per step).
        tile = _choose_batch_tile(B, max_batch_tile)
        nb = pl.cdiv(B, tile)
        b_pad = nb * tile
        if b_pad != B:
            # Ragged tail: zero-pad the lane axis; padded columns are sliced
            # off below (they compute relu(b1) etc., harmlessly).
            x_t = jnp.pad(x_t, ((0, 0), (0, b_pad - B)))
        flops = 2 * b_pad * (S * H + H * A_pad)
        bytes_accessed = 4 * (S * b_pad + A_pad * b_pad
                              + H * S + H + A_pad * H + A_pad)
        mu_t = pl.pallas_call(
            policy_kernel,
            out_shape=jax.ShapeDtypeStruct((A_pad, b_pad), out_dtype),
            grid=(nb,),
            in_specs=[
                pl.BlockSpec((S, tile), lambda i: (0, i)),
                pl.BlockSpec((H, S), lambda i: (0, 0)),
                pl.BlockSpec((H, 1), lambda i: (0, 0)),
                pl.BlockSpec((A_pad, H), lambda i: (0, 0)),
                pl.BlockSpec((A_pad, 1), lambda i: (0, 0)),
            ],
            out_specs=pl.BlockSpec((A_pad, tile), lambda i: (0, i)),
            compiler_params=pltpu.CompilerParams(
                dimension_semantics=("parallel",)),
            cost_estimate=pl.CostEstimate(
                flops=flops, transcendentals=0, bytes_accessed=bytes_accessed),
        )(x_t, w1, b1, w2p, b2p)
    else:
        # Small-batch (per-step RL) path: no grid, whole arrays resident in
        # VMEM, no pipeline machinery.  Dominated by dispatch overhead anyway.
        vmem = pl.BlockSpec(memory_space=pltpu.MemorySpace.VMEM)
        mu_t = pl.pallas_call(
            policy_kernel,
            out_shape=jax.ShapeDtypeStruct((A_pad, B), out_dtype),
            in_specs=[vmem] * 5,
            out_specs=vmem,
        )(x_t, w1, b1, w2p, b2p)

    # Cheap slice: only (A_pad, B) = (8, B) f32 is touched, not a 128-lane slab.
    mu = mu_t[:A, :B].T
    sigma = params["sigma"]
    # TODO(synk): torch.distributions.Normal object itself has no Pallas
    # equivalent; we return its parameters (mu, sigma) instead.
    return mu, sigma


if __name__ == "__main__":
    key = jax.random.PRNGKey(0)
    kx, kp, kbig = jax.random.split(key, 3)

    batch = 2
    state_space = 8
    action_space = 2
    hidden = 64

    w1, b1, w2, b2, sigma0 = init_policy_params(kp, state_space, action_space, hidden)
    params = prepare_policy_params(w1, b1, w2, b2, sigma0)

    def reference(xv):
        h = jnp.maximum(xv @ w1.T + b1, 0.0)
        return h @ w2.T + b2

    # --- small-batch path (per-step RL inference) ---
    x = jax.random.normal(kx, (batch, state_space), dtype=jnp.float32)
    mu, sigma = policy_forward(x, params)
    jax.block_until_ready(mu)
    jax.block_until_ready(sigma)
    assert mu.shape == (batch, action_space)
    assert jnp.allclose(mu, reference(x), atol=1e-5, rtol=1e-5), "mu mismatch (small)"
    assert jnp.allclose(sigma, 10.0), "sigma mismatch"

    # --- batch-tiled path (rollout / training batch, ragged B) ---
    big_batch = 1000  # not a multiple of the tile: exercises cdiv + padding
    x_big = jax.random.normal(kbig, (big_batch, state_space), dtype=jnp.float32)
    mu_big, sigma_big = policy_forward(x_big, params)
    jax.block_until_ready(mu_big)
    assert mu_big.shape == (big_batch, action_space)
    assert jnp.allclose(mu_big, reference(x_big), atol=1e-4, rtol=1e-4), "mu mismatch (tiled)"
    assert jnp.allclose(sigma_big, 10.0), "sigma mismatch (tiled)"

    print("KERNEL_OK")
</pallas_src>

<mosaic_0001>
module attributes {stable_mosaic.version = 11 : i64} {
  func.func @policy_kernel(%arg0: memref<8x2xf32, #tpu.memory_space<vmem>>, %arg1: memref<64x8xf32, #tpu.memory_space<vmem>>, %arg2: memref<64x1xf32, #tpu.memory_space<vmem>>, %arg3: memref<8x64xf32, #tpu.memory_space<vmem>>, %arg4: memref<8x1xf32, #tpu.memory_space<vmem>>, %arg5: memref<8x2xf32, #tpu.memory_space<vmem>>) attributes {dimension_semantics = [], scalar_prefetch = 0 : i64, scratch_operands = 0 : i64, tpu.core_type = #tpu.core_type<tc>} {
    %c0 = arith.constant 0 : index
    %c0_0 = arith.constant 0 : index
    %0 = vector.load %arg1[%c0, %c0_0] : memref<64x8xf32, #tpu.memory_space<vmem>>, vector<64x8xf32>
    %c0_1 = arith.constant 0 : index
    %c0_2 = arith.constant 0 : index
    %1 = vector.load %arg0[%c0_1, %c0_2] : memref<8x2xf32, #tpu.memory_space<vmem>>, vector<8x2xf32>
    %cst = arith.constant dense<0.000000e+00> : vector<64x2xf32>
    %2 = tpu.matmul %0, %1, %cst {dimension_numbers = #tpu.dot_dimension_numbers<[1], [0], [0], [1], [0, 0, 1, 1], [], []>} : vector<64x8xf32>, vector<8x2xf32>, vector<64x2xf32> -> vector<64x2xf32>
    %c0_3 = arith.constant 0 : index
    %c0_4 = arith.constant 0 : index
    %3 = vector.load %arg2[%c0_3, %c0_4] : memref<64x1xf32, #tpu.memory_space<vmem>>, vector<64x1xf32>
    %4 = vector.broadcast %3 : vector<64x1xf32> to vector<64x2xf32>
    %5 = arith.addf %2, %4 : vector<64x2xf32>
    %cst_5 = arith.constant 0.000000e+00 : f32
    %6 = vector.broadcast %cst_5 : f32 to vector<64x2xf32>
    %7 = arith.maximumf %5, %6 : vector<64x2xf32>
    %c0_6 = arith.constant 0 : index
    %c0_7 = arith.constant 0 : index
    %8 = vector.load %arg3[%c0_6, %c0_7] : memref<8x64xf32, #tpu.memory_space<vmem>>, vector<8x64xf32>
    %cst_8 = arith.constant dense<0.000000e+00> : vector<8x2xf32>
    %9 = tpu.matmul %8, %7, %cst_8 {dimension_numbers = #tpu.dot_dimension_numbers<[1], [0], [0], [1], [0, 0, 1, 1], [], []>} : vector<8x64xf32>, vector<64x2xf32>, vector<8x2xf32> -> vector<8x2xf32>
    %c0_9 = arith.constant 0 : index
    %c0_10 = arith.constant 0 : index
    %10 = vector.load %arg4[%c0_9, %c0_10] : memref<8x1xf32, #tpu.memory_space<vmem>>, vector<8x1xf32>
    %11 = vector.broadcast %10 : vector<8x1xf32> to vector<8x2xf32>
    %12 = arith.addf %9, %11 : vector<8x2xf32>
    %c0_11 = arith.constant 0 : index
    %c0_12 = arith.constant 0 : index
    %13 = vector.load %arg5[%c0_11, %c0_12] : memref<8x2xf32, #tpu.memory_space<vmem>>, vector<8x2xf32>
    tpu.vector_store %arg5[%c0_11, %c0_12], %12 {strides = array<i32>} : memref<8x2xf32, #tpu.memory_space<vmem>>, vector<8x2xf32>,
    return
  }
}

</mosaic_0001>

<bundles_post_ra>
// kernel: tpu_custom_call.1
= control target key start
LH: loop header
LB: loop body
LE: loop exit
PB: predicated region body
PF: predicated region fallthrough
CT: control target
= control target key end

     0   :  { %vm77_vm0 = vcmask 64512   ;;  %v367_v3 = vmov 0   ;;  %v368_v19 = vmov 0.0   ;;  %vm369_vm1 = vmmov 0   ;;  %s468_s0 = inlined_call_operand.vmem [shape: f32[8,2], index: 0, kind: input, shape index: {}]   ;;  %s469_s1 = inlined_call_operand.vmem [shape: f32[64,8], index: 1, kind: input, shape index: {}]   ;;  %s470_s2 = inlined_call_operand.vmem [shape: f32[64,1], index: 2, kind: input, shape index: {}]   ;;  %s471_s4 = inlined_call_operand.vmem [shape: f32[8,1], index: 4, kind: input, shape index: {}]   ;;  %s472_s3 = inlined_call_operand.vmem [shape: f32[8,64], index: 3, kind: input, shape index: {}]   ;;  %s473_s5 = inlined_call_operand.vmem [shape: f32[8,2], index: 5, kind: output, shape index: {}]  }
   0x1   :  { %v28_v0 = vld [vmem:[%s468_s0] sm:$0xff]  ;;  %v21_v2 = vld [vmem:[%s469_s1 + $0x8] sm:$0xff]  ;;  %365 = vset.pattern.permute.xlu0 %v367_v3  ;;  %366 = vset.pattern.permute.xlu1 %v367_v3  ;;  %v22_v4 = vld [vmem:[%s469_s1 + $0x10] sm:$0xff]  ;;  %vm222_vm2 = vcmask 523264   ;;  %vm296_vm3 = vcmask 15360  }
   0x2   :  { %v20_v1 = vld [vmem:[%s469_s1] sm:$0xff]  ;;  %329 = vmatprep.subr.mxu0 %v28_v0  ;;  %v36_v5 = vld [vmem:[%s470_s2 + $0x38] sm:$0xff]  ;;  %v34_v6 = vld [vmem:[%s470_s2 + $0x28] sm:$0xff]  ;;  %343 = vmatprep.subr.mxu1 %v368_v19 }
   0x3   :  { %331 = vmatprep.mubr.msk.f32.mxu0 %vm77_vm0, %v20_v1  ;;  %330 = vmatpush3.msra.mxu0 %v28_v0  ;;  %v23_v7 = vld [vmem:[%s469_s1 + $0x18] sm:$0xff]  ;;  %v24_v8 = vld [vmem:[%s469_s1 + $0x20] sm:$0xff]  ;;  %v35_v9 = vld [vmem:[%s470_s2 + $0x30] sm:$0xff] }
   0x4   :  { %332 = vmatmul.mubr.msk.f32.vlgmr.msra.gmra.mxu0 %vm77_vm0, %v21_v2  ;;  %74 = vperm.xlu0 %365, %v36_v5   ;;  %v33_v10 = vld [vmem:[%s470_s2 + $0x20] sm:$0xff]  ;;  %v25_v11 = vld [vmem:[%s469_s1 + $0x28] sm:$0xff]  ;;  %v26_v12 = vld [vmem:[%s469_s1 + $0x30] sm:$0xff] }
   0x5   :  { %334 = vmatprep.mubr.msk.f32.mxu0 %vm77_vm0, %v22_v4  ;;  %64 = vperm.xlu1 %366, %v34_v6   ;;  %v32_v13 = vld [vmem:[%s470_s2 + $0x18] sm:$0xff]  ;;  %v31_v14 = vld [vmem:[%s470_s2 + $0x10] sm:$0xff]  ;;  %v30_v16 = vld [vmem:[%s470_s2 + $0x8] sm:$0xff] }
   0x6   :  { %v27_v15 = vld [vmem:[%s469_s1 + $0x38] sm:$0xff]  ;;  %v29_v17 = vld [vmem:[%s470_s2] sm:$0xff]  ;;  %359 = vmatprep.mubr.msk.f32.mxu1 %vm369_vm1, %v368_v19 }
   0x7   :  { %v216_v18 = vld [vmem:[%s471_s4] sm:$0xff] }
   0x8   :  { %335 = vmatmul.mubr.msk.f32.gmra.mxu0 %vm77_vm0, %v23_v7  ;;  %69 = vperm.xlu0 %365, %v35_v9   ;;  %v215_v52 = vld [vmem:[%s472_s3] sm:$0xff] }
   0x9   :  { %337 = vmatprep.mubr.msk.f32.mxu0 %vm77_vm0, %v24_v8  ;;  %59 = vperm.xlu1 %366, %v33_v10  }
   0xc   :  { %338 = vmatmul.mubr.msk.f32.gmra.mxu0 %vm77_vm0, %v25_v11  ;;  %54 = vperm.xlu0 %365, %v32_v13  }
   0xd   :  { %340 = vmatprep.mubr.msk.f32.mxu0 %vm77_vm0, %v26_v12  ;;  %49 = vperm.xlu1 %366, %v31_v14  }
  0x10   :  { %341 = vmatmul.mubr.msk.f32.gmra.mxu0 %vm77_vm0, %v27_v15  ;;  %44 = vperm.xlu0 %365, %v30_v16  }
  0x11   :  { %39 = vperm.xlu1 %366, %v29_v17  }
  0x14   :  { %219 = vperm.xlu0 %365, %v216_v18  }
  0x7f   :  { %v75_v21 = vpop.permute.xlu0 %74 }
  0x80   :  { %v65_v23 = vpop.permute.xlu1 %64 }
  0x83   :  { %v70_v26 = vpop.permute.xlu0 %69 }
  0x84   :  { %v60_v28 = vpop.permute.xlu1 %59 }
  0x87   :  { %v55_v32 = vpop.permute.xlu0 %54 }
  0x88   :  { %v50_v37 = vpop.permute.xlu1 %49 }
  0x8b   :  { %v45_v42 = vpop.permute.xlu0 %44 }
  0x8c   :  { %v40_v45 = vpop.permute.xlu1 %39 }
  0x8f   :  { %v220_v53 = vpop.permute.xlu0 %219 }
  0xc4   :  { %v333_v20 = vpop.f32.mrf.mxu0 }
  0xc5   :  { %v174_v46 = vadd.f32 %v333_v20, %v45_v42 }
  0xc6   :  { %v168_v22 = vpop.f32.mrf.mxu0 }
  0xc7   :  { %v169_v48 = vadd.f32 %v168_v22, %v40_v45  ;;  %v208_v50 = vmax.f32 %v174_v46, 0.0 }
  0xc8   :  { %v336_v24 = vpop.f32.mrf.mxu0 }
  0xc9   :  { %v184_v40 = vadd.f32 %v336_v24, %v55_v32  ;;  %v207_v51 = vmax.f32 %v169_v48, 0.0 }
  0xca   :  { %v178_v25 = vpop.f32.mrf.mxu0 }
  0xcb   :  { %v179_v43 = vadd.f32 %v178_v25, %v50_v37  ;;  %v210_v47 = vmax.f32 %v184_v40, 0.0 }
  0xcc   :  { %v339_v27 = vpop.f32.mrf.mxu0 }
  0xcd   :  { %v194_v34 = vadd.f32 %v339_v27, %v65_v23  ;;  %v209_v49 = vmax.f32 %v179_v43, 0.0 }
  0xce   :  { %v188_v29 = vpop.f32.mrf.mxu0 }
  0xcf   :  { %v189_v38 = vadd.f32 %v188_v29, %v60_v28  ;;  %v212_v41 = vmax.f32 %v194_v34, 0.0 }
  0xd0   :  { %v342_v30 = vpop.f32.mrf.mxu0 }
  0xd1   :  { %v204_v31 = vadd.f32 %v342_v30, %v75_v21  ;;  %v211_v44 = vmax.f32 %v189_v38, 0.0 }
  0xd2   :  { %v198_v33 = vpop.f32.mrf.mxu0 }
  0xd3   :  { %v214_v35 = vmax.f32 %v204_v31, 0.0  ;;  %v199_v36 = vadd.f32 %v198_v33, %v70_v26 }
  0xd5   :  { %v213_v39 = vmax.f32 %v199_v36, 0.0  ;;  %344 = vmatpush3.msra.mxu1 %v214_v35 }
  0xd6   :  { %345 = vmatprep.subr.mxu1 %v368_v19 }
  0xd7   :  { %346 = vmatpush3.msra.mxu1 %v213_v39 }
  0xd8   :  { %347 = vmatprep.subr.mxu1 %v368_v19 }
  0xd9   :  { %348 = vmatpush3.msra.mxu1 %v212_v41 }
  0xda   :  { %349 = vmatprep.subr.mxu1 %v368_v19 }
  0xdb   :  { %350 = vmatpush3.msra.mxu1 %v211_v44 }
  0xdc   :  { %351 = vmatprep.subr.mxu1 %v368_v19 }
  0xdd   :  { %352 = vmatpush3.msra.mxu1 %v210_v47 }
  0xde   :  { %353 = vmatprep.subr.mxu1 %v368_v19 }
  0xdf   :  { %354 = vmatpush3.msra.mxu1 %v209_v49 }
  0xe0   :  { %355 = vmatprep.subr.mxu1 %v368_v19 }
  0xe1   :  { %356 = vmatpush3.msra.mxu1 %v208_v50 }
  0xe2   :  { %357 = vmatprep.subr.mxu1 %v368_v19 }
  0xe3   :  { %358 = vmatpush3.msra.mxu1 %v207_v51 }
  0xe4   :  { %360 = vmatmul.mubr.msk.f32.vlgmr.msra.gmra.mxu1 %vm222_vm2, %v215_v52 }
 0x1a4   :  { %v292_v54 = vpop.f32.mrf.mxu1 }
 0x1a5   :  { %v293_v55 = vadd.f32 %v292_v54, %v220_v53 }
 0x1a6   :  { %v361_v56 = vpop.f32.mrf.mxu1 }
 0x1a7   :  { %297 = vst.msk [vmem:[%s473_s5] sm:$0xff] %vm296_vm3, %v293_v55 }

</bundles_post_ra>
